<compile_context>
chip_gen: v7x
topology: tpu7x:2x2x1
jax: 0.10.0
libtpu: 0.0.40
codegen_flags: <defaults>
</compile_context>

<pallas_src>
import jax
import jax.numpy as jnp
from jax.experimental import pallas as pl
from jax.experimental.pallas import tpu as pltpu


def _round_up(x: int, m: int) -> int:
    return ((x + m - 1) // m) * m


def _round_down(x: int, m: int) -> int:
    return (x // m) * m


def _vmem_capacity_bytes() -> int:
    """Per-TensorCore VMEM (128 MiB on v5e/v6e, 64 MiB on v7x).

    Falls back to the smallest (v7x, 64 MiB) so we never over-request.
    """
    try:
        return int(pltpu.get_tpu_info().vmem_capacity_bytes)
    except Exception:  # noqa: BLE001 - any failure -> conservative default
        return 64 << 20


# --------------------------------------------------------------------------
# Kernels
# --------------------------------------------------------------------------
def _residual_linear_kernel(x_ref, w_ref, b_ref, o_ref):
    """o = (x @ W + b) + x for one (TM, Dp) row tile (W fully VMEM-resident).

    x_ref : (TM, Dp)  activation dtype
    w_ref : (Dp, Dp)  weight dtype (bf16 by default), resident across steps
    b_ref : (1, Dp)   f32
    o_ref : (TM, Dp)  activation dtype
    """
    x = x_ref[...]
    y = jnp.dot(x.astype(w_ref.dtype), w_ref[...],
                preferred_element_type=jnp.float32)       # MXU, f32 accumulate
    y = y + b_ref[...]                                    # bias in f32
    o_ref[...] = (y + x.astype(jnp.float32)).astype(o_ref.dtype)


def _residual_linear_coltiled_kernel(x_ref, xres_ref, w_ref, b_ref, o_ref):
    """Large-D fallback: o[:, jTN:(j+1)TN] = x @ W[:, jTN:(j+1)TN] + b + x[:, ...].

    x_ref    : (TM, Dp)  full row of x (resident across the column axis)
    xres_ref : (TM, TN)  residual slice matching the output columns
    w_ref    : (Dp, TN)  weight column block
    b_ref    : (1, TN)   f32
    o_ref    : (TM, TN)
    """
    y = jnp.dot(x_ref[...].astype(w_ref.dtype), w_ref[...],
                preferred_element_type=jnp.float32)
    y = y + b_ref[...]
    o_ref[...] = (y + xres_ref[...].astype(jnp.float32)).astype(o_ref.dtype)


# --------------------------------------------------------------------------
# Wrapper
# --------------------------------------------------------------------------
def residual_add(x, w, b, *, tm=None, weight_dtype=jnp.bfloat16):
    """y = fn(x) + x with fn = Linear(D, D), fused into one Pallas kernel.

    x: (B, N, D), w: (D, D), b: (D,).

    Precision note: with the default weight_dtype=jnp.bfloat16 the matmul runs
    bf16 x bf16 -> f32 on the MXU (bias + residual in f32); pass
    weight_dtype=jnp.float32 for exact f32 Linear semantics.
    """
    B, N, D = x.shape
    M = B * N
    x_bytes = jnp.dtype(x.dtype).itemsize
    w_itemsize = jnp.dtype(weight_dtype).itemsize

    # Lane axis: pad D to a multiple of 128 only when necessary; the row (M)
    # axis is never padded — Pallas masks the ragged last row tile.
    Dp = _round_up(D, 128)
    pad_d = Dp != D

    x2d = x.reshape(M, D)
    if pad_d:
        x2d = jnp.pad(x2d, ((0, 0), (0, Dp - D)))
        wp = jnp.pad(w, ((0, Dp - D), (0, Dp - D)))
        bp = jnp.pad(b, (0, Dp - D))
    else:
        wp, bp = w, b
    wp = wp.astype(weight_dtype)
    bp = bp.astype(jnp.float32).reshape(1, Dp)

    vmem_cap = _vmem_capacity_bytes()
    vmem_ceiling = vmem_cap * 7 // 8          # leave room for Mosaic scratch
    headroom = 4 << 20
    w_bytes = Dp * Dp * w_itemsize            # single-buffered (Buffered(1))
    b_bytes = 8 * Dp * 4                      # sublane-padded bias

    def _pick_tm(tm_req, tm_max, tm_cap):
        if tm_req is None:
            t = min(tm_cap, tm_max)
            if t >= 256:
                t = _round_down(t, 256)       # full MXU passes on v6e/v7x
            elif t >= 128:
                t = 128
            else:
                t = _round_down(max(t, 8), 8)
        else:
            t = tm_req
        t = max(8, min(t, _round_up(M, 8)))   # never bigger than (padded) M
        return _round_up(t, 8)

    if w_bytes <= vmem_cap // 2:
        # ------------------- resident-W path (common case) -------------------
        # Per-row VMEM: x + out double-buffered, f32 matmul result, bf16 x copy.
        per_row = Dp * (2 * x_bytes + 2 * x_bytes + 4 + w_itemsize)
        budget = vmem_ceiling - headroom - w_bytes - b_bytes
        tm_max = max(budget // per_row, 8)
        TM = _pick_tm(tm, tm_max, 1024)

        grid = (pl.cdiv(M, TM),)
        vmem_bytes = int(min(max(TM * per_row + w_bytes + b_bytes + headroom,
                                 16 << 20), vmem_ceiling))
        cost = pl.CostEstimate(
            flops=2 * M * Dp * Dp,
            transcendentals=0,
            bytes_accessed=(2 * M * Dp * x_bytes          # x in + out
                            + Dp * Dp * w_itemsize        # W
                            + Dp * 4))                    # b

        out = pl.pallas_call(
            _residual_linear_kernel,
            out_shape=jax.ShapeDtypeStruct((M, Dp), x.dtype),
            grid_spec=pltpu.PrefetchScalarGridSpec(
                num_scalar_prefetch=0,
                grid=grid,
                in_specs=[
                    pl.BlockSpec((TM, Dp), lambda i: (i, 0)),        # x row tile
                    pl.BlockSpec((Dp, Dp), lambda i: (0, 0),
                                 pipeline_mode=pl.Buffered(1)),      # resident W
                    pl.BlockSpec((1, Dp), lambda i: (0, 0),
                                 pipeline_mode=pl.Buffered(1)),      # resident b
                ],
                out_specs=pl.BlockSpec((TM, Dp), lambda i: (i, 0)),
            ),
            compiler_params=pltpu.CompilerParams(
                dimension_semantics=("parallel",),   # shard M across TCs (v7x)
                vmem_limit_bytes=vmem_bytes),
            cost_estimate=cost,
        )(x2d, wp, bp)
    else:
        # --------- column-tiled fallback (W too large to stay resident) ------
        TN = 512 if Dp % 512 == 0 else (256 if Dp % 256 == 0 else 128)
        # Per-row VMEM: x row (2 bufs) + bf16 x copy + [xres + out (2 bufs) +
        # f32 y] on the TN slice.
        per_row = Dp * (2 * x_bytes + w_itemsize) + TN * (4 * x_bytes + 4)
        w_blk = 2 * Dp * TN * w_itemsize                  # streamed W blocks
        b_blk = 2 * 8 * TN * 4
        budget = vmem_ceiling - headroom - w_blk - b_blk
        tm_max = max(budget // per_row, 8)
        TM = _pick_tm(tm, tm_max, 512)

        grid = (pl.cdiv(M, TM), Dp // TN)                 # TN divides Dp
        vmem_bytes = int(min(max(TM * per_row + w_blk + b_blk + headroom,
                                 16 << 20), vmem_ceiling))
        cost = pl.CostEstimate(
            flops=2 * M * Dp * Dp,
            transcendentals=0,
            bytes_accessed=(3 * M * Dp * x_bytes                       # x (x2) + out
                            + pl.cdiv(M, TM) * Dp * Dp * w_itemsize    # W per M tile
                            + Dp * 4))

        out = pl.pallas_call(
            _residual_linear_coltiled_kernel,
            out_shape=jax.ShapeDtypeStruct((M, Dp), x.dtype),
            grid_spec=pltpu.PrefetchScalarGridSpec(
                num_scalar_prefetch=0,
                grid=grid,
                in_specs=[
                    pl.BlockSpec((TM, Dp), lambda i, j: (i, 0)),  # x full row
                    pl.BlockSpec((TM, TN), lambda i, j: (i, j)),  # residual slice
                    pl.BlockSpec((Dp, TN), lambda i, j: (0, j)),  # W column block
                    pl.BlockSpec((1, TN), lambda i, j: (0, j)),   # bias slice
                ],
                out_specs=pl.BlockSpec((TM, TN), lambda i, j: (i, j)),
            ),
            compiler_params=pltpu.CompilerParams(
                dimension_semantics=("parallel", "parallel"),
                vmem_limit_bytes=vmem_bytes),
            cost_estimate=cost,
        )(x2d, x2d, wp, bp)

    # TODO(synk): optionally alias x2d to the output (input_output_aliases)
    # when the caller donates x and D % 128 == 0; minor footprint-only win.
    if pad_d:
        out = out[:, :D]
    return out.reshape(B, N, D)


if __name__ == "__main__":
    B, N, D = 2, 8, 32

    key = jax.random.PRNGKey(0)
    kx, kw, kb = jax.random.split(key, 3)

    x = jax.random.normal(kx, (B, N, D), dtype=jnp.float32)
    # Deterministic "fn" parameters (Linear(D, D)).
    w = jax.random.normal(kw, (D, D), dtype=jnp.float32) * 0.05
    b = jax.random.normal(kb, (D,), dtype=jnp.float32) * 0.01

    y = residual_add(x, w, b)
    jax.block_until_ready(y)

    # Reference: y == (x @ W + b) + x (f32 reference; kernel matmul runs in
    # bf16 with f32 accumulation, hence the bf16-appropriate tolerance).
    ref = jnp.einsum("bnd,de->bne", x, w) + b + x
    assert jnp.allclose(y, ref, atol=2e-2, rtol=2e-2), "mismatch vs reference"

    print("KERNEL_OK")
</pallas_src>

<mosaic_0001>
module attributes {stable_mosaic.version = 11 : i64} {
  func.func @_residual_linear_kernel(%arg0: i32, %arg1: memref<16x128xf32, #tpu.memory_space<vmem>>, %arg2: memref<128x128xbf16, #tpu.memory_space<vmem>>, %arg3: memref<1x128xf32, #tpu.memory_space<vmem>>, %arg4: memref<16x128xf32, #tpu.memory_space<vmem>>) attributes {dimension_semantics = [#tpu.dimension_semantics<parallel>], iteration_bounds = array<i64: 1>, scalar_prefetch = 0 : i64, scratch_operands = 0 : i64, tpu.core_type = #tpu.core_type<tc>, window_params = [{transform_indices = @transform_0, window_bounds = array<i64: 16, 128>}, {pipeline_mode = #tpu.pipeline_mode<synchronous>, transform_indices = @transform_1, window_bounds = array<i64: 128, 128>}, {pipeline_mode = #tpu.pipeline_mode<synchronous>, transform_indices = @transform_2, window_bounds = array<i64: 1, 128>}, {transform_indices = @transform_3, window_bounds = array<i64: 16, 128>}]} {
    %c0 = arith.constant 0 : index
    %c0_0 = arith.constant 0 : index
    %0 = vector.load %arg1[%c0, %c0_0] : memref<16x128xf32, #tpu.memory_space<vmem>>, vector<16x128xf32>
    %1 = arith.truncf %0 : vector<16x128xf32> to vector<16x128xbf16>
    %c0_1 = arith.constant 0 : index
    %c0_2 = arith.constant 0 : index
    %2 = vector.load %arg2[%c0_1, %c0_2] : memref<128x128xbf16, #tpu.memory_space<vmem>>, vector<128x128xbf16>
    %cst = arith.constant dense<0.000000e+00> : vector<16x128xf32>
    %3 = tpu.matmul %1, %2, %cst {dimension_numbers = #tpu.dot_dimension_numbers<[1], [0], [0], [1], [0, 0, 1, 1], [], []>} : vector<16x128xbf16>, vector<128x128xbf16>, vector<16x128xf32> -> vector<16x128xf32>
    %c0_3 = arith.constant 0 : index
    %c0_4 = arith.constant 0 : index
    %4 = vector.load %arg3[%c0_3, %c0_4] : memref<1x128xf32, #tpu.memory_space<vmem>>, vector<1x128xf32>
    %5 = vector.broadcast %4 : vector<1x128xf32> to vector<16x128xf32>
    %6 = arith.addf %3, %5 : vector<16x128xf32>
    %7 = arith.addf %6, %0 : vector<16x128xf32>
    %c0_5 = arith.constant 0 : index
    %c0_6 = arith.constant 0 : index
    %8 = vector.load %arg4[%c0_5, %c0_6] : memref<16x128xf32, #tpu.memory_space<vmem>>, vector<16x128xf32>
    tpu.vector_store %arg4[%c0_5, %c0_6], %7 {strides = array<i32>} : memref<16x128xf32, #tpu.memory_space<vmem>>, vector<16x128xf32>,
    return
  }
  func.func @transform_0(%arg0: i32) -> (i32, i32) {
    %c0_i32 = arith.constant 0 : i32
    %c0_i32_0 = arith.constant 0 : i32
    return %arg0, %c0_i32 : i32, i32
  }
  func.func @transform_1(%arg0: i32) -> (i32, i32) {
    %c0_i32 = arith.constant 0 : i32
    %c0_i32_0 = arith.constant 0 : i32
    %c0_i32_1 = arith.constant 0 : i32
    return %c0_i32, %c0_i32_0 : i32, i32
  }
  func.func @transform_2(%arg0: i32) -> (i32, i32) {
    %c0_i32 = arith.constant 0 : i32
    %c0_i32_0 = arith.constant 0 : i32
    %c0_i32_1 = arith.constant 0 : i32
    return %c0_i32, %c0_i32_0 : i32, i32
  }
  func.func @transform_3(%arg0: i32) -> (i32, i32) {
    %c0_i32 = arith.constant 0 : i32
    %c0_i32_0 = arith.constant 0 : i32
    return %arg0, %c0_i32 : i32, i32
  }
}

</mosaic_0001>

<bundles_post_ra>
// kernel: tpu_custom_call.1
= control target key start
LH: loop header
LB: loop body
LE: loop exit
PB: predicated region body
PF: predicated region fallthrough
CT: control target
= control target key end

     0   :  { %8 = vsyncpa [#allocation3], 0  ;;  %s382_s0 = inlined_call_operand.hbm [shape: f32[16,128], index: 0, kind: input, shape index: {}]   ;;  %s383_s1 = inlined_call_operand.hbm [shape: bf16[128,128], index: 1, kind: input, shape index: {}]   ;;  %s384_s2 = inlined_call_operand.vmem [shape: f32[1,128], index: 2, kind: input, shape index: {}]   ;;  %s385_s3 = inlined_call_operand.hbm [shape: f32[16,128], index: 3, kind: output, shape index: {}]  }
   0x1   :  { %9 = vsyncpa [#allocation6], 0 }
   0x2   :  { %10 = vsyncpa [#allocation4], 0  ;;  %s308_s12 = smov [#allocation2]   ;;  %s236_s16 = scalar_lea.hbm %s382_s0, 256 }
   0x3   :  { %s16_s13 = sshll.u32 %s308_s12, 4  ;;  %p237_p0 = scmp.ne.s32.totalorder %s382_s0, %s236_s16  ;;  %s17_s13 = int_to_ptr.vmem [resolvable:$true] %s16_s13 }
   0x4   :  { %p240_p1 = scmp.lt.u32.totalorder %s236_s16, %s382_s0 }
   0x6   :  { %p242_p2 = pnand %p240_p1, %p237_p0 }
   0x8   :  { %245 = shalt.err (!%p242_p2)
}
   0x9   :  { %s246_s21 = scalar_lea.vmem %s17_s13, 256  ;;  %p251_p4 = scmp.lt.s32.totalorder %s17_s13, %s17_s13 }
   0xa   :  { %p247_p3 = scmp.ne.s32.totalorder %s17_s13, %s246_s21  ;;  %p252_p5 = scmp.lt.s32.totalorder %s246_s21, %s246_s21 }
   0xc   :  { %p253_p6 = por %p252_p5, %p251_p4 }
   0xe   :  { %p254_p7 = pnand %p253_p6, %p247_p3 }
  0x10   :  { %257 = shalt.err (!%p254_p7)
}
  0x11   :  { %s309_s22 = smov 128   ;;  %s310_s23 = smov 8  }
  0x12   :  { %22 = dma.hbm_to_vmem [thread:$0]  %s382_s0, 256, %s17_s13, [#allocation3], %s309_s22, %s309_s22, %s310_s23  }
  0x13   :  { %s311_s26 = smov [#allocation5]   ;;  %s258_s30 = scalar_lea.hbm %s383_s1, 1024 }
  0x14   :  { %s28_s27 = sshll.u32 %s311_s26, 4  ;;  %p259_p8 = scmp.ne.s32.totalorder %s383_s1, %s258_s30  ;;  %s29_s27 = int_to_ptr.vmem [resolvable:$true] %s28_s27 }
  0x15   :  { %p262_p9 = scmp.lt.u32.totalorder %s258_s30, %s383_s1 }
  0x17   :  { %p264_p10 = pnand %p262_p9, %p259_p8 }
  0x19   :  { %267 = shalt.err (!%p264_p10)
}
  0x1a   :  { %s268_s8 = scalar_lea.vmem %s29_s27, 1024  ;;  %p273_p12 = scmp.lt.s32.totalorder %s29_s27, %s29_s27 }
  0x1b   :  { %p269_p11 = scmp.ne.s32.totalorder %s29_s27, %s268_s8  ;;  %p274_p13 = scmp.lt.s32.totalorder %s268_s8, %s268_s8 }
  0x1d   :  { %p275_p0 = por %p274_p13, %p273_p12 }
  0x1f   :  { %p276_p1 = pnand %p275_p0, %p269_p11 }
  0x21   :  { %279 = shalt.err (!%p276_p1)
}
  0x22   :  { %s312_s0 = smov 64   ;;  %s313_s9 = smov 4  }
  0x23   :  { %34 = dma.hbm_to_vmem [thread:$0]  %s383_s1, 1024, %s29_s27, [#allocation6], %s312_s0, %s312_s0, %s313_s9  }
  0x24   :  { %302 = dma.done.wait [#allocation3], 256  }
  0x25   :  { %303 = vsyncadd [#allocation3], 4294967040 }
  0x26   :  { %304 = dma.done.wait [#allocation6], 1024  }
  0x27   :  { %305 = vsyncadd [#allocation6], 4294966272  ;;  %v314_v0 = vmov 0.0   ;;  %vm315_vm0 = vmmov 0   ;;  %v228_v1 = vld [vmem:[#allocation5] sm:$0xff]   ;;  %v229_v2 = vld [vmem:[#allocation5 + $0x8] sm:$0xff]  }
  0x28   :  { %199 = vmatprep.subr.bf16.mxu0 %v314_v0  ;;  %215 = vmatprep.mubr.msk.bf16.mxu0 %vm315_vm0, %v314_v0  ;;  %v230_v3 = vld [vmem:[#allocation5 + $0x10] sm:$0xff]   ;;  %v231_v4 = vld [vmem:[#allocation5 + $0x18] sm:$0xff]   ;;  %v232_v5 = vld [vmem:[#allocation5 + $0x20] sm:$0xff]   ;;  %s316_s13 = smov [#allocation7]  }
  0x29   :  { %200 = vmatpush3.bf16.msra.mxu0 %v228_v1  ;;  %v233_v6 = vld [vmem:[#allocation5 + $0x28] sm:$0xff]   ;;  %v234_v7 = vld [vmem:[#allocation5 + $0x30] sm:$0xff]   ;;  %v235_v8 = vld [vmem:[#allocation5 + $0x38] sm:$0xff]   ;;  %s168_s14 = sshll.u32 %s316_s13, 4  ;;  %s169_s14 = int_to_ptr.vmem [resolvable:$true] %s168_s14 }
  0x2a   :  { %201 = vmatprep.subr.bf16.mxu0 %v314_v0  ;;  %v44_v9 = vld [vmem:[#allocation2] sm:$0xff]  ;;  %v45_v10 = vld [vmem:[#allocation2 + $0x8] sm:$0xff]  ;;  %s280_s15 = scalar_lea.vmem %s169_s14, 256  ;;  %p285_p3 = scmp.lt.s32.totalorder %s169_s14, %s169_s14 }
  0x2b   :  { %v46_v11 = vpack.c.bf16 %v45_v10, %v44_v9  ;;  %v181_v12 = vld [vmem:[%s384_s2] ss:$0 sm:$0xff]  ;;  %p281_p2 = scmp.ne.s32.totalorder %s169_s14, %s280_s15  ;;  %p286_p4 = scmp.lt.s32.totalorder %s280_s15, %s280_s15 }
  0x2d   :  { %202 = vmatpush3.bf16.msra.mxu0 %v229_v2  ;;  %p287_p5 = por %p286_p4, %p285_p3 }
  0x2e   :  { %203 = vmatprep.subr.bf16.mxu0 %v314_v0 }
  0x2f   :  { %p288_p6 = pnand %p287_p5, %p281_p2 }
  0x31   :  { %204 = vmatpush3.bf16.msra.mxu0 %v230_v3 }
  0x32   :  { %205 = vmatprep.subr.bf16.mxu0 %v314_v0 }
  0x35   :  { %206 = vmatpush3.bf16.msra.mxu0 %v231_v4 }
  0x36   :  { %207 = vmatprep.subr.bf16.mxu0 %v314_v0 }
  0x39   :  { %208 = vmatpush3.bf16.msra.mxu0 %v232_v5 }
  0x3a   :  { %209 = vmatprep.subr.bf16.mxu0 %v314_v0 }
  0x3d   :  { %210 = vmatpush3.bf16.msra.mxu0 %v233_v6 }
  0x3e   :  { %211 = vmatprep.subr.bf16.mxu0 %v314_v0 }
  0x41   :  { %212 = vmatpush3.bf16.msra.mxu0 %v234_v7 }
  0x42   :  { %213 = vmatprep.subr.bf16.mxu0 %v314_v0 }
  0x45   :  { %214 = vmatpush3.bf16.msra.mxu0 %v235_v8 }
  0x48   :  { %216 = vmatmul.mubr.bf16.vlgmr.msra.gmra.mrb[0].mxu0 %v46_v11 }
 0x11b   :  { %v152_v13 = vpop.f32.mrb[0].mxu0 }
 0x11c   :  { %v153_v14 = vadd.f32 %v181_v12, %v152_v13  ;;  %v217_v15 = vpop.f32.mrb[1].mxu0 }
 0x11d   :  { %v155_v16 = vpop.f32.mrb[2].mxu0 }
 0x11e   :  { %v159_v17 = vadd.f32 %v153_v14, %v44_v9  ;;  %v156_v18 = vadd.f32 %v181_v12, %v155_v16  ;;  %v218_v19 = vpop.f32.mrb[3].mxu0 }
 0x120   :  { %161 = vst [vmem:[#allocation7] sm:$0xff] %v159_v17  ;;  %v160_v20 = vadd.f32 %v156_v18, %v45_v10 }
 0x122   :  { %162 = vst [vmem:[#allocation7 + $0x8] sm:$0xff] %v160_v20 }
 0x123   :  { %291 = shalt.err (!%p288_p6)
}
 0x124   :  { %s292_s17 = scalar_lea.hbm %s385_s3, 256 }
 0x125   :  { %p293_p7 = scmp.ne.s32.totalorder %s385_s3, %s292_s17  ;;  %p296_p8 = scmp.lt.u32.totalorder %s292_s17, %s385_s3 }
 0x127   :  { %p298_p9 = pnand %p296_p8, %p293_p7 }
 0x129   :  { %301 = shalt.err (!%p298_p9)
}
 0x12a   :  { %174 = dma.vmem_to_hbm [thread:$0]  %s169_s14, 256, %s385_s3, [#allocation4], %s309_s22, %s309_s22, %s310_s23  }
 0x12b   :  { %306 = dma.done.wait [#allocation4], 256  }
 0x12c   :  { %307 = vsyncadd [#allocation4], 4294967040 }
 0x12d   :  { %178 = vsyncpa [#allocation3], 1 }
 0x12e   :  { %179 = vsyncpa [#allocation6], 1 }
 0x12f   :  { %180 = vsyncpa [#allocation4], 1 }

</bundles_post_ra>
